<compile_context>
chip_gen: v7x
topology: tpu7x:2x2x1
jax: 0.10.0
libtpu: 0.0.40
codegen_flags: <defaults>
</compile_context>

<pallas_src>
import jax
import jax.numpy as jnp
from jax.experimental import pallas as pl
from jax.experimental.pallas import tpu as pltpu


def _round_up(x, m):
    return (x + m - 1) // m * m


def clip_text_embeddings(input_ids, token_table, position_table, position_ids=None):
    """input_ids: (B, S) int -> (B, S, D) in token_table.dtype (token + position embedding)."""
    B, S = input_ids.shape
    V, D = token_table.shape
    P, _ = position_table.shape
    dtype = token_table.dtype
    itemsize = jnp.dtype(dtype).itemsize

    # ---- tile sizes --------------------------------------------------------
    sub = 8 if itemsize >= 4 else 16            # sublane multiple (f32: 8, bf16: 16)
    TM = min(_round_up(S, sub), 128)            # tokens per grid step
    S_pad = _round_up(S, TM)
    n_blk = S_pad // TM
    NFLIGHT = min(16, TM)                       # outstanding row-gather DMAs

    # ---- token ids: clamp, pad, flatten (int32 SMEM scalar prefetch) -------
    ids = jnp.clip(input_ids.astype(jnp.int32), 0, V - 1)
    ids = jnp.pad(ids, ((0, 0), (0, S_pad - S)))
    flat_ids = ids.reshape(-1)                  # (B * S_pad,)

    # ---- position-embedding slab (tiny table -> VMEM-tiled input) ----------
    if position_ids is None:
        # Default positions are arange(S) per sequence: a contiguous slice of
        # the table, shared across the batch.
        n_pos = min(S, P)
        pos_slab = jnp.zeros((1, S_pad, D), dtype)
        pos_slab = pos_slab.at[0, :n_pos, :].set(position_table[:n_pos].astype(dtype))
        PB = 1
    else:
        # Arbitrary position_ids: resolve with a cheap XLA gather on the tiny
        # (P, D) table; the expensive token gather stays inside the kernel.
        pid = jnp.clip(position_ids.astype(jnp.int32), 0, P - 1)
        pid = jnp.broadcast_to(pid, (B, S))
        pos_rows = jnp.take(position_table, pid.reshape(-1), axis=0).reshape(B, S, D)
        pos_slab = jnp.zeros((B, S_pad, D), dtype)
        pos_slab = pos_slab.at[:, :S, :].set(pos_rows.astype(dtype))
        PB = B

    # ---- kernel -------------------------------------------------------------
    def kernel(ids_ref, tok_tbl_hbm, pos_ref, out_ref, tok_buf, sems):
        # ids_ref:     SMEM (B*S_pad,) int32   (scalar prefetch)
        # tok_tbl_hbm: HBM  (V, D)              (memory_space=pl.ANY, manual DMA)
        # pos_ref:     VMEM (TM, D)             (BlockSpec-tiled position slab)
        # out_ref:     VMEM (TM, D)             (output tile)
        # tok_buf:     VMEM (TM, D)  scratch    (gathered token rows)
        # sems:        DMA semaphore pool (NFLIGHT,)
        b = pl.program_id(0)
        j = pl.program_id(1)
        base = b * S_pad + j * TM

        def start(r):
            row = ids_ref[base + r]
            pltpu.make_async_copy(
                tok_tbl_hbm.at[row], tok_buf.at[r], sems.at[r % NFLIGHT]
            ).start()

        def wait(r):
            pltpu.make_async_copy(
                tok_tbl_hbm.at[0], tok_buf.at[r], sems.at[r % NFLIGHT]
            ).wait()

        # Windowed row gather: keep NFLIGHT small (2 KiB) copies in flight.
        @pl.loop(0, NFLIGHT)
        def _(r):
            start(r)

        if TM > NFLIGHT:
            @pl.loop(0, TM - NFLIGHT)
            def _(r):
                wait(r)
                start(r + NFLIGHT)

        @pl.loop(max(TM - NFLIGHT, 0), TM)
        def _(r):
            wait(r)

        # One vectorized add over the whole sublane/lane-dense tile.
        out_ref[...] = (tok_buf[...] + pos_ref[...]).astype(out_ref.dtype)

    # ---- pallas_call --------------------------------------------------------
    cost = pl.CostEstimate(
        flops=B * S * D,
        transcendentals=0,
        bytes_accessed=(2 * B * S_pad * D + min(S, P) * D) * itemsize,
    )

    out = pl.pallas_call(
        kernel,
        out_shape=jax.ShapeDtypeStruct((B, S_pad, D), dtype),
        grid_spec=pltpu.PrefetchScalarGridSpec(
            num_scalar_prefetch=1,                  # flat_ids -> SMEM
            grid=(B, n_blk),
            in_specs=[
                # Token table stays in HBM; do NOT make it VMEM-resident
                # (real CLIP vocab ~97 MB > v7x's 64 MiB VMEM).
                pl.BlockSpec(memory_space=pl.ANY),
                # Position slab: contiguous (TM, D) tile, auto-pipelined.
                pl.BlockSpec(
                    (None, TM, D),
                    lambda b, j, ids, _pb=PB: (0 if _pb == 1 else b, j, 0),
                ),
            ],
            out_specs=pl.BlockSpec((None, TM, D), lambda b, j, ids: (b, j, 0)),
            scratch_shapes=[
                pltpu.VMEM((TM, D), dtype),
                pltpu.SemaphoreType.DMA((NFLIGHT,)),
            ],
        ),
        compiler_params=pltpu.CompilerParams(
            dimension_semantics=("parallel", "parallel")),
        cost_estimate=cost,
    )(flat_ids, token_table, pos_slab)

    return out[:, :S, :]


if __name__ == "__main__":
    # Small synthetic config (CLIPTextConfig-like):
    vocab_size = 64
    max_position_embeddings = 16
    hidden_size = 32
    batch = 2
    seq = 8

    key = jax.random.PRNGKey(0)
    k_tok, k_pos, k_ids = jax.random.split(key, 3)

    token_table = jax.random.normal(k_tok, (vocab_size, hidden_size), dtype=jnp.float32) * 0.02
    position_table = (
        jax.random.normal(k_pos, (max_position_embeddings, hidden_size), dtype=jnp.float32) * 0.02
    )
    input_ids = jax.random.randint(k_ids, (batch, seq), 0, vocab_size, dtype=jnp.int32)

    # Default (position_ids=None) path.
    out = clip_text_embeddings(input_ids, token_table, position_table)
    out = jax.block_until_ready(out)

    pos_ids = jnp.broadcast_to(jnp.arange(seq, dtype=jnp.int32)[None, :], (batch, seq))
    ref = token_table[input_ids] + position_table[pos_ids]
    assert out.shape == (batch, seq, hidden_size)
    assert jnp.allclose(out, ref, atol=1e-6, rtol=1e-6)

    # Explicit (custom) position_ids path.
    custom_pos = jnp.broadcast_to(
        jnp.arange(seq, dtype=jnp.int32)[::-1][None, :], (batch, seq))
    out2 = clip_text_embeddings(input_ids, token_table, position_table, position_ids=custom_pos)
    out2 = jax.block_until_ready(out2)
    ref2 = token_table[input_ids] + position_table[custom_pos]
    assert jnp.allclose(out2, ref2, atol=1e-6, rtol=1e-6)

    print("KERNEL_OK")
</pallas_src>

<mosaic_0001>
module attributes {stable_mosaic.version = 11 : i64} {
  func.func @kernel(%arg0: i32, %arg1: i32, %arg2: memref<16xi32, #tpu.memory_space<smem>>, %arg3: memref<64x32xf32, #tpu.memory_space<any>>, %arg4: memref<1x8x32xf32, #tpu.memory_space<vmem>>, %arg5: memref<1x8x32xf32, #tpu.memory_space<vmem>>, %arg6: memref<8x32xf32, #tpu.memory_space<vmem>>, %arg7: memref<8x!tpu.dma_semaphore, #tpu.memory_space<semaphore_mem>>) attributes {dimension_semantics = [#tpu.dimension_semantics<parallel>, #tpu.dimension_semantics<parallel>], iteration_bounds = array<i64: 2, 1>, scalar_prefetch = 1 : i64, scratch_operands = 2 : i64, tpu.core_type = #tpu.core_type<tc>, window_params = [{}, {transform_indices = @transform_1, window_bounds = array<i64: 1, 8, 32>}, {transform_indices = @transform_2, window_bounds = array<i64: 1, 8, 32>}]} {
    %c8_i32 = arith.constant 8 : i32
    %0 = arith.muli %arg0, %c8_i32 : i32
    %c8_i32_0 = arith.constant 8 : i32
    %1 = arith.muli %arg1, %c8_i32_0 : i32
    %2 = arith.addi %0, %1 : i32
    %c0_i32 = arith.constant 0 : i32
    %c8_i32_1 = arith.constant 8 : i32
    %3 = arith.addi %c0_i32, %c8_i32_1 : i32
    %c1_i32 = arith.constant 1 : i32
    scf.for %arg8 = %c0_i32 to %3 step %c1_i32  : i32 {
      %c1_i32_14 = arith.constant 1 : i32
      %12 = arith.muli %arg8, %c1_i32_14 : i32
      %c0_i32_15 = arith.constant 0 : i32
      %13 = arith.addi %c0_i32_15, %12 : i32
      %14 = arith.addi %2, %13 : i32
      %15 = arith.index_cast %14 : i32 to index
      %16 = memref.load %arg2[%15] : memref<16xi32, #tpu.memory_space<smem>>
      %c8_i32_16 = arith.constant 8 : i32
      %c0_i32_17 = arith.constant 0 : i32
      %17 = arith.cmpi eq, %c8_i32_16, %c0_i32_17 : i32
      %c1_i32_18 = arith.constant 1 : i32
      %18 = arith.select %17, %c1_i32_18, %c8_i32_16 : i32
      %19 = arith.remsi %13, %18 : i32
      %c0_i32_19 = arith.constant 0 : i32
      %20 = arith.cmpi ne, %19, %c0_i32_19 : i32
      %c0_i32_20 = arith.constant 0 : i32
      %21 = arith.cmpi slt, %19, %c0_i32_20 : i32
      %c0_i32_21 = arith.constant 0 : i32
      %22 = arith.cmpi slt, %18, %c0_i32_21 : i32
      %23 = arith.xori %21, %22 : i1
      %24 = arith.andi %23, %20 : i1
      %25 = arith.addi %19, %18 : i32
      %26 = arith.select %24, %25, %19 : i32
      %c0_i32_22 = arith.constant 0 : i32
      %27 = tpu.memref_slice %arg3[%16, %c0_i32_22] : memref<64x32xf32, #tpu.memory_space<any>> -> memref<1x32xf32, #tpu.memory_space<any>>
      %28 = tpu.memref_squeeze %27 : memref<1x32xf32, #tpu.memory_space<any>> -> memref<32xf32, #tpu.memory_space<any>>
      %c0_i32_23 = arith.constant 0 : i32
      %29 = tpu.memref_slice %arg6[%13, %c0_i32_23] : memref<8x32xf32, #tpu.memory_space<vmem>> -> memref<1x32xf32, #tpu.memory_space<vmem>>
      %30 = tpu.memref_squeeze %29 : memref<1x32xf32, #tpu.memory_space<vmem>> -> memref<32xf32, #tpu.memory_space<vmem>>
      %31 = tpu.memref_slice %arg7[%26] : memref<8x!tpu.dma_semaphore, #tpu.memory_space<semaphore_mem>> -> memref<1x!tpu.dma_semaphore, #tpu.memory_space<semaphore_mem>>
      %32 = tpu.memref_squeeze %31 : memref<1x!tpu.dma_semaphore, #tpu.memory_space<semaphore_mem>> -> memref<!tpu.dma_semaphore, #tpu.memory_space<semaphore_mem>>
      tpu.enqueue_dma source(%28 : memref<32xf32, #tpu.memory_space<any>>) target(%30 : memref<32xf32, #tpu.memory_space<vmem>>) target_semaphore(%32 : memref<!tpu.dma_semaphore, #tpu.memory_space<semaphore_mem>>)
    }
    %c8_i32_2 = arith.constant 8 : i32
    %c0_i32_3 = arith.constant 0 : i32
    %c8_i32_4 = arith.constant 8 : i32
    %4 = arith.addi %c0_i32_3, %c8_i32_4 : i32
    %c1_i32_5 = arith.constant 1 : i32
    scf.for %arg8 = %c0_i32_3 to %4 step %c1_i32_5  : i32 {
      %c1_i32_14 = arith.constant 1 : i32
      %12 = arith.muli %arg8, %c1_i32_14 : i32
      %c0_i32_15 = arith.constant 0 : i32
      %13 = arith.addi %c0_i32_15, %12 : i32
      %c8_i32_16 = arith.constant 8 : i32
      %c0_i32_17 = arith.constant 0 : i32
      %14 = arith.cmpi eq, %c8_i32_16, %c0_i32_17 : i32
      %c1_i32_18 = arith.constant 1 : i32
      %15 = arith.select %14, %c1_i32_18, %c8_i32_16 : i32
      %16 = arith.remsi %13, %15 : i32
      %c0_i32_19 = arith.constant 0 : i32
      %17 = arith.cmpi ne, %16, %c0_i32_19 : i32
      %c0_i32_20 = arith.constant 0 : i32
      %18 = arith.cmpi slt, %16, %c0_i32_20 : i32
      %c0_i32_21 = arith.constant 0 : i32
      %19 = arith.cmpi slt, %15, %c0_i32_21 : i32
      %20 = arith.xori %18, %19 : i1
      %21 = arith.andi %20, %17 : i1
      %22 = arith.addi %16, %15 : i32
      %23 = arith.select %21, %22, %16 : i32
      %c0_i32_22 = arith.constant 0 : i32
      %c0_i32_23 = arith.constant 0 : i32
      %24 = tpu.memref_slice %arg3[%c0_i32_22, %c0_i32_23] : memref<64x32xf32, #tpu.memory_space<any>> -> memref<1x32xf32, #tpu.memory_space<any>>
      %25 = tpu.memref_squeeze %24 : memref<1x32xf32, #tpu.memory_space<any>> -> memref<32xf32, #tpu.memory_space<any>>
      %c0_i32_24 = arith.constant 0 : i32
      %26 = tpu.memref_slice %arg6[%13, %c0_i32_24] : memref<8x32xf32, #tpu.memory_space<vmem>> -> memref<1x32xf32, #tpu.memory_space<vmem>>
      %27 = tpu.memref_squeeze %26 : memref<1x32xf32, #tpu.memory_space<vmem>> -> memref<32xf32, #tpu.memory_space<vmem>>
      %28 = tpu.memref_slice %arg7[%23] : memref<8x!tpu.dma_semaphore, #tpu.memory_space<semaphore_mem>> -> memref<1x!tpu.dma_semaphore, #tpu.memory_space<semaphore_mem>>
      %29 = tpu.memref_squeeze %28 : memref<1x!tpu.dma_semaphore, #tpu.memory_space<semaphore_mem>> -> memref<!tpu.dma_semaphore, #tpu.memory_space<semaphore_mem>>
      tpu.wait_dma2 semaphore(%29 : memref<!tpu.dma_semaphore, #tpu.memory_space<semaphore_mem>>) src(%25 : memref<32xf32, #tpu.memory_space<any>>) dst(%27 : memref<32xf32, #tpu.memory_space<vmem>>)
    }
    %c8_i32_6 = arith.constant 8 : i32
    %c0 = arith.constant 0 : index
    %c0_7 = arith.constant 0 : index
    %5 = vector.load %arg6[%c0, %c0_7] : memref<8x32xf32, #tpu.memory_space<vmem>>, vector<8x32xf32>
    %c0_8 = arith.constant 0 : index
    %c0_9 = arith.constant 0 : index
    %c0_10 = arith.constant 0 : index
    %6 = vector.load %arg4[%c0_8, %c0_9, %c0_10] : memref<1x8x32xf32, #tpu.memory_space<vmem>>, vector<1x8x32xf32>
    %7 = vector.shape_cast %6 : vector<1x8x32xf32> to vector<8x32xf32>
    %8 = arith.addf %5, %7 : vector<8x32xf32>
    %c0_11 = arith.constant 0 : index
    %c0_12 = arith.constant 0 : index
    %c0_13 = arith.constant 0 : index
    %9 = vector.load %arg5[%c0_11, %c0_12, %c0_13] : memref<1x8x32xf32, #tpu.memory_space<vmem>>, vector<1x8x32xf32>
    %10 = vector.shape_cast %9 : vector<1x8x32xf32> to vector<8x32xf32>
    %11 = vector.shape_cast %8 : vector<8x32xf32> to vector<1x8x32xf32>
    tpu.vector_store %arg5[%c0_11, %c0_12, %c0_13], %11 {strides = array<i32>} : memref<1x8x32xf32, #tpu.memory_space<vmem>>, vector<1x8x32xf32>,
    return
  }
  func.func @transform_1(%arg0: i32, %arg1: i32, %arg2: memref<16xi32, #tpu.memory_space<smem>>) -> (i32, i32, i32) {
    %c0_i32 = arith.constant 0 : i32
    %c0_i32_0 = arith.constant 0 : i32
    %c0_i32_1 = arith.constant 0 : i32
    return %c0_i32, %arg1, %c0_i32_0 : i32, i32, i32
  }
  func.func @transform_2(%arg0: i32, %arg1: i32, %arg2: memref<16xi32, #tpu.memory_space<smem>>) -> (i32, i32, i32) {
    %c0_i32 = arith.constant 0 : i32
    %c0_i32_0 = arith.constant 0 : i32
    return %arg0, %arg1, %c0_i32 : i32, i32, i32
  }
}

</mosaic_0001>

<bundles_post_ra>
// kernel: tpu_custom_call.1
= control target key start
LH: loop header
LB: loop body
LE: loop exit
PB: predicated region body
PF: predicated region fallthrough
CT: control target
= control target key end

     0   :  { %s754_s0 = inlined_call_operand.vmem [shape: s32[16], index: 0, kind: input, shape index: {}]   ;;  %s755_s1 = inlined_call_operand.vmem [shape: f32[64,32], index: 1, kind: input, shape index: {}]   ;;  %s756_s2 = inlined_call_operand.vmem [shape: f32[1,8,32], index: 2, kind: input, shape index: {}]   ;;  %s757_s3 = inlined_call_operand.hbm [shape: f32[2,8,32], index: 3, kind: output, shape index: {}]  }
   0x1   :  { %s8_s14 = sshll.u32 %s754_s0, 4  ;;  %s9_s14 = int_to_ptr.vmem [resolvable:$true] %s8_s14 }
   0x2   :  { %s492_s15 = scalar_lea.vmem %s9_s14, 16  ;;  %p497_p1 = scmp.lt.s32.totalorder %s9_s14, %s9_s14 }
   0x3   :  { %p493_p0 = scmp.ne.s32.totalorder %s9_s14, %s492_s15  ;;  %p498_p2 = scmp.lt.s32.totalorder %s492_s15, %s492_s15 }
   0x5   :  { %p499_p3 = por %p498_p2, %p497_p1 }
   0x7   :  { %p500_p4 = pnand %p499_p3, %p493_p0 }
   0x9   :  { %503 = shalt.err (!%p500_p4)  }
   0xa   :  { %s604_s16 = smov [#allocation5]  }
   0xb   :  { %11 = dma.vmem_to_smem %s9_s14, 16, %s604_s16, [#allocation4] }
   0xc   :  { %564 = dma.done.wait [#allocation4], 16 }
   0xd   :  { %565 = vsyncadd [#allocation4], 4294967280 }
   0xe   :  { %13 = sfence }
   0xf   :  { %14 = vsyncpa [#allocation7], 0 }
  0x10   :  { %16 = vsyncpa [#allocation7 + $0x1], 0  ;;  %s629_s17 = smov 0   ;;  %s631_s18 = smov 0  }
  0x11   :  { %s633_s0 = smov 0   ;;  %s635_s19 = smov 0  }
  0x12   :  { %s637_s20 = smov 0   ;;  %s639_s21 = smov 0  }
  0x13 LB: > { %s395_s22 = sadd.s32 4294967295, %s594_s21   ;;  %s396_s23 = sadd.s32 4294967294, %s594_s21   ;;  %s594_s21 = sphi %s639_s21, %s22_s21   ;;  %s590_s20 = sphi %s637_s20, %s764_s20   ;;  %s586_s19 = sphi %s635_s19, %s763_s19   ;;  %s582_s0 = sphi %s633_s0, %s762_s0   ;;  %s578_s18 = sphi %s631_s18, %s761_s18   ;;  %s574_s17 = sphi %s629_s17, %s760_s17  }
  0x14   : > { %s34_s24 = sadd.s32 1, %s590_s20  ;;  %s69_s25 = sadd.s32 1, %s582_s0 }
  0x15   : > { %p36_p5 = scmp.ge.s32.totalorder %s34_s24, 2  ;;  %p79_p6 = scmp.ne.s32.totalorder %s582_s0, %s578_s18 }
  0x16   : > { %p80_p7 = scmp.eq.s32.totalorder %s395_s22, 1  ;;  %p85_p8 = scmp.ne.s32.totalorder %s578_s18, %s574_s17 }
  0x17   : > { %s766_s24 = smov (%p36_p5, %s34_s24), 0  ;;  %p86_p10 = scmp.eq.s32.totalorder %s396_s23, 1 }
  0x18   : > { %p669_p9 = por %p80_p7, %p79_p6  ;;  %s64_s27 = ssub.s32 %s590_s20, %s766_s24 }
  0x19   : > { %p399_p11 = scmp.ge.s32.totalorder %s594_s21, 1  ;;  %p67_p12 = scmp.eq.s32.totalorder %s64_s27, 0 }
  0x1a   : > { %p676_p13 = por %p86_p10, %p85_p8  ;;  %p111_p0 = scmp.lt.s32.totalorder %s594_s21, 3 }
  0x1b   : > { %s682_s29 = scalar_select %p67_p12, %s582_s0, %s69_s25  }
  0x1c   : > { %p112_p1 = pnand %p399_p11, %p111_p0 }
  0x1d   : > { %s127_s30 = sand.u32 (!%p112_p1), 1, %s578_s18   ;;  %s401_s4 = sshll.u32 (!%p112_p1), %s586_s19, 3 }
  0x1e   : > { %115 = sbr.rel (%p112_p1) target bundleno = 94 (0x5e), region = 24  ;;  %s688_s5 = sshll.u32 (!%p112_p1), %s127_s30, 3 }
  0x1f   : > { %s129_s6 = scalar_lea.vmem (!%p112_p1), [#allocation6], %s688_s5  ;;  %s596_s7 = smov (!%p112_p1), 0  }
  0x25 LB: >> { %s143_s8 = sadd.s32 %s598_s7, %s401_s4  ;;  %p145_p2 = scmp.lt.s32.totalorder %s598_s7, 0  ;;  %s598_s7 = sphi %s596_s7, %s142_s7  }
  0x26   : >> { %s144_s9 = sld [smem:[#allocation5 + %s143_s8]]  ;;  %s146_s10 = ssub.s32 0, %s598_s7 }
  0x27   : >> { %s402_s11 = smin.u32 %s598_s7, %s146_s10  ;;  %s158_s23 = scalar_lea.vmem [#allocation2], %s598_s7 }
  0x28   : >> { %s148_s12 = sand.u32 7, %s402_s11  }
  0x29   : >> { %s149_s13 = ssub.s32 0, %s148_s12 }
  0x2a   : >> { %s768_s13 = smov (!%p145_p2, %s149_s13), %s148_s12 }
  0x2b   : >> { %p404_p3 = scmp.lt.s32.totalorder %s768_s13, 0  ;;  %s155_s14 = sadd.s32 8, %s768_s13 }
  0x2c   : >> { %s157_s22 = scalar_lea.vmem %s755_s1, %s144_s9 }
  0x2d   : >> { %s770_s14 = smov (!%p404_p3, %s155_s14), %s768_s13  ;;  %v177_v0 = vld [vmem:[%s157_s22] sm:$0x1] }
  0x2e   : >> { %178 = vst [vmem:[%s158_s23] sm:$0x1] %v177_v0  ;;  %s159_s25 = scalar_lea.sflag [#allocation3], %s770_s14 }
  0x2f   : >> { %203 = vsyncadd %s159_s25, 16  ;;  %s142_s7 = sadd.s32 1, %s598_s7  }
  0x30   : >> { %p139_p4 = scmp.ge.s32.totalorder %s142_s7, 8  }
  0x31   : > { %s600_s27 = smov (%p139_p4), 0  }
  0x32   : > { %141 = sbr.rel (!%p139_p4) target bundleno = 37 (0x25), region = 124 }
  0x39 LB: >> { %p210_p5 = scmp.lt.s32.totalorder %s602_s27, 0  ;;  %s211_s8 = ssub.s32 0, %s602_s27  ;;  %s602_s27 = sphi %s600_s27, %s209_s27  }
  0x3a   : >> { %s405_s10 = smin.u32 %s602_s27, %s211_s8 }
  0x3b   : >> { %s213_s11 = sand.u32 7, %s405_s10  }
  0x3c   : >> { %s214_s12 = ssub.s32 0, %s213_s11 }
  0x3d   : >> { %s772_s12 = smov (!%p210_p5, %s214_s12), %s213_s11 }
  0x3e   : >> { %p407_p6 = scmp.lt.s32.totalorder %s772_s12, 0  ;;  %s220_s9 = sadd.s32 8, %s772_s12 }
  0x40   : >> { %s774_s9 = smov (!%p407_p6, %s220_s9), %s772_s12 }
  0x41   : >> { %s222_s13 = scalar_lea.sflag [#allocation3], %s774_s9 }
  0x42   : >> { %566 = dma.done.wait %s222_s13, 16 }
  0x43   : >> { %567 = vsyncadd %s222_s13, 4294967280  ;;  %s209_s27 = sadd.s32 1, %s602_s27  }
  0x44   : >> { %p206_p7 = scmp.ge.s32.totalorder %s209_s27, 8  }
  0x45   : > { %v225_v1 = vld [vmem:[#allocation2] sm:$0xff] (%p206_p7)  ;;  %vm228_vm0 = vcmask (%p206_p7), 261120   ;;  %s409_s14 = sshll.u32 (%p206_p7), %s586_s19, 7  ;;  %s245_s23 = sshll.u32 (%p206_p7), %s129_s6, 4  ;;  %s705_s23 = int_to_ptr.vmem [resolvable:$true] %s245_s23 }
  0x46   : > { %208 = sbr.rel (!%p206_p7) target bundleno = 57 (0x39), region = 135  ;;  %v226_v2 = vld [vmem:[%s756_s2] sm:$0xff] (%p206_p7)  ;;  %s701_s22 = scalar_lea.hbm (%p206_p7), %s757_s3, %s409_s14 }
  0x47   : > { %v227_v3 = vadd.f32 (%p206_p7), %v226_v2, %v225_v1  ;;  %s231_s25 = scalar_lea.sflag (%p206_p7), [#allocation7], %s127_s30  ;;  %s504_s27 = scalar_lea.vmem (%p206_p7), %s705_s23, 128 }
  0x48   : > { %p505_p8 = scmp.ne.s32.totalorder (%p206_p7), %s705_s23, %s504_s27  ;;  %s605_s19 = smov (%p206_p7), [#allocation6]  }
  0x49   : > { %229 = vst.msk [vmem:[%s129_s6] sm:$0xff] (%p206_p7), %vm228_vm0, %v227_v3  ;;  %s508_s8 = sshll.u32 (%p206_p7), %s605_s19, 4  ;;  %s509_s8 = int_to_ptr.vmem [resolvable:$false] %s508_s8 }
  0x4a   : > { %p506_p10 = pnand (%p206_p7), %p505_p8, %p669_p9  ;;  %s510_s10 = scalar_lea.vmem (%p206_p7), %s509_s8, 256 }
  0x4b   : > { %p511_p12 = scmp.lt.s32.totalorder (%p206_p7), %s705_s23, %s509_s8  ;;  %p512_p0 = scmp.lt.s32.totalorder (%p206_p7), %s510_s10, %s504_s27 }
  0x4c   : > { %p507_p11 = pneg (%p206_p7), %p506_p10 }
  0x4d   : > { %p513_p1 = por %p512_p0, %p511_p12 }
  0x4f   : > { %p514_p2 = pnand %p513_p1, %p507_p11 }
  0x51   : > { %517 = shalt.err (!%p514_p2)
}
  0x52   : > { %s518_s30 = scalar_lea.hbm %s701_s22, 128  ;;  %s522_s11 = scalar_lea.hbm %s757_s3, 256 }
  0x53   : > { %p519_p3 = scmp.ne.s32.totalorder %s701_s22, %s518_s30  ;;  %p523_p6 = scmp.lt.u32.totalorder %s701_s22, %s757_s3 }
  0x54   : > { %p524_p7 = scmp.lt.u32.totalorder %s522_s11, %s518_s30  ;;  %p526_p10 = scmp.lt.u32.totalorder %s518_s30, %s701_s22 }
  0x55   : > { %p520_p4 = pnand %p519_p3, %p669_p9 }
  0x56   : > { %p525_p8 = por %p524_p7, %p523_p6 }
  0x57   : > { %p521_p5 = pneg %p520_p4 }
  0x58   : > { %p527_p11 = por %p526_p10, %p525_p8 }
  0x5a   : > { %p528_p12 = pnand %p527_p11, %p521_p5 }
  0x5c   : > { %531 = shalt.err (!%p528_p12)
}
  0x5d   : > { %420 = dma.vmem_to_hbm [thread:$0]  (%p669_p9), %s705_s23, 128, %s701_s22, %s231_s25  }
  0x5e PF: > { %p426_p0 = scmp.ge.s32.totalorder %s594_s21, 2  ;;  %s257_s13 = sand.u32 1, %s574_s17  }
  0x5f   : > { %s258_s4 = scalar_lea.sflag [#allocation7], %s257_s13 }
  0x60   : > { %p423_p1 = pnand %p426_p0, %p676_p13 }
  0x62   : > { %569 = dma.done.wait (!%p423_p1), %s258_s4, 128  }
  0x63   : > { %571 = vsyncadd (!%p423_p1), %s258_s4, 4294967168  ;;  %s22_s21 = sadd.s32 1, %s594_s21   ;;  %s760_s17 = smov %s578_s18 }
  0x64   : > { %p19_p2 = scmp.ge.s32.totalorder %s22_s21, 4   ;;  %s761_s18 = smov %s582_s0 }
  0x65   : > { %s762_s0 = smov %s682_s29  ;;  %s763_s19 = smov %s590_s20 }
  0x66   : > { %s764_s20 = smov %s766_s24  ;;  %21 = sbr.rel (!%p19_p2) target bundleno = 19 (0x13), region = 146 }
  0x6d   :  { %263 = vsyncpa [#allocation7], 1 }
  0x6e   :  { %265 = vsyncpa [#allocation7 + $0x1], 1 }
  0x6f   :  { %266 = vsyncmov [#allocation3] }
  0x72   :  { %s267_s26 = vpop.sfrf %266 }
  0x73   :  { %p412_p9 = scmp.ne.s32.totalorder %s267_s26, 0 }
  0x75   :  { %271 = shalt.err (%p412_p9)  }
  0x76   :  { %273 = vsyncmov [#allocation3 + $0x1] }
  0x79   :  { %s274_s28 = vpop.sfrf %273 }
  0x7a   :  { %p413_p13 = scmp.ne.s32.totalorder %s274_s28, 0 }
  0x7c   :  { %278 = shalt.err (%p413_p13)  }
  0x7d   :  { %280 = vsyncmov [#allocation3 + $0x2] }
  0x80   :  { %s281_s7 = vpop.sfrf %280 }
  0x81   :  { %p414_p3 = scmp.ne.s32.totalorder %s281_s7, 0 }
  0x83   :  { %285 = shalt.err (%p414_p3)  }
  0x84   :  { %287 = vsyncmov [#allocation3 + $0x3] }
  0x87   :  { %s288_s29 = vpop.sfrf %287 }
  0x88   :  { %p415_p4 = scmp.ne.s32.totalorder %s288_s29, 0 }
  0x8a   :  { %292 = shalt.err (%p415_p4)  }
  0x8b   :  { %294 = vsyncmov [#allocation3 + $0x4] }
  0x8e   :  { %s295_s21 = vpop.sfrf %294 }
  0x8f   :  { %p416_p5 = scmp.ne.s32.totalorder %s295_s21, 0 }
  0x91   :  { %299 = shalt.err (%p416_p5)  }
  0x92   :  { %301 = vsyncmov [#allocation3 + $0x5] }
  0x95   :  { %s302_s1 = vpop.sfrf %301 }
  0x96   :  { %p417_p6 = scmp.ne.s32.totalorder %s302_s1, 0 }
  0x98   :  { %306 = shalt.err (%p417_p6)  }
  0x99   :  { %308 = vsyncmov [#allocation3 + $0x6] }
  0x9c   :  { %s309_s2 = vpop.sfrf %308 }
  0x9d   :  { %p418_p7 = scmp.ne.s32.totalorder %s309_s2, 0 }
  0x9f   :  { %313 = shalt.err (%p418_p7)  }
  0xa0   :  { %315 = vsyncmov [#allocation3 + $0x7] }
  0xa3   :  { %s316_s3 = vpop.sfrf %315 }
  0xa4   :  { %p419_p8 = scmp.ne.s32.totalorder %s316_s3, 0 }
  0xa6   :  { %320 = shalt.err (%p419_p8)  }

</bundles_post_ra>
